<compile_context>
chip_gen: v5e
topology: v5e:2x2
jax: 0.10.0
libtpu: 0.0.40
codegen_flags: <defaults>
</compile_context>

<pallas_src>
import functools

import jax
import jax.numpy as jnp
from jax.experimental import pallas as pl
from jax.experimental.pallas import tpu as pltpu


def _round_up(x, m):
    return ((x + m - 1) // m) * m


def mlp_bow_kernel(ids_ref, emb_ref, w1_ref, b1_ref, w2_ref, b2_ref, out_ref,
                   *, num_classes):
    Bt, S = ids_ref.shape
    V = emb_ref.shape[0]
    w_dtype = emb_ref.dtype                     # f32 here; bf16 at production sizes

    # --- bag-of-words counts: (Bt, V), accumulated over s (no 3-D one-hot) -----
    vocab_iota = jax.lax.broadcasted_iota(jnp.int32, (Bt, V), 1)
    counts = jnp.zeros((Bt, V), jnp.float32)
    for s in range(S):                           # static unroll, S is small
        ids_col = ids_ref[:, s:s + 1]            # (Bt, 1) int32, broadcast over lanes
        counts = counts + (vocab_iota == ids_col).astype(jnp.float32)

    # --- mean embedding via one MXU matmul; 1/S folded AFTER the matmul in f32 -
    sum_emb = jnp.dot(counts.astype(w_dtype), emb_ref[...],
                      preferred_element_type=jnp.float32)           # (Bt, E_pad)
    mean_emb = sum_emb * jnp.float32(1.0 / S)

    # --- linear1 + ReLU (bias / ReLU kept in f32) -------------------------------
    hidden = jnp.dot(mean_emb.astype(w_dtype), w1_ref[...],
                     preferred_element_type=jnp.float32)
    hidden = jnp.maximum(hidden + b1_ref[...].astype(jnp.float32), 0.0)  # (Bt, H_pad)

    # --- linear2 ----------------------------------------------------------------
    logits = jnp.dot(hidden.astype(w_dtype), w2_ref[...],
                     preferred_element_type=jnp.float32)
    logits = logits + b2_ref[...].astype(jnp.float32)                # (Bt, O_pad)

    # mask padded class columns so softmax only sees the real classes
    col = jax.lax.broadcasted_iota(jnp.int32, logits.shape, 1)
    logits = jnp.where(col < num_classes, logits, jnp.float32(-1e30))

    # --- softmax over classes (max-subtracted, exact normalization) -------------
    m = jnp.max(logits, axis=1, keepdims=True)
    e = jnp.exp(logits - m)
    denom = jnp.sum(e, axis=1, keepdims=True)
    out_ref[...] = (e / denom).astype(out_ref.dtype)


def mlp_forward(ids, emb, w1, b1, w2, b2, *, matmul_dtype=jnp.float32):
    B, S = ids.shape
    V, E = emb.shape
    H = w1.shape[1]
    O = w2.shape[1]

    LANE, SUB = 128, 8

    # Batch tile: as big as 128 rows to fill the MXU, but split into >= 2 tiles
    # when the batch allows so the "parallel" grid axis spans both v7x TCs.
    B_sub = _round_up(B, SUB)
    if B_sub <= 2 * SUB:
        Bt = B_sub
    else:
        Bt = min(128, _round_up(B_sub // 2, SUB))
    B_pad = _round_up(B_sub, Bt)

    V_pad = _round_up(V, LANE)
    E_pad = _round_up(E, LANE)
    H_pad = _round_up(H, LANE)
    O_pad = _round_up(O, LANE)
    # TODO(synk): for v6e/v7x production builds with bf16 operands, pad E/H/O to
    # 256 (MXU is 2x256x256 there); 128 is already optimal for v5e.

    # Zero-pad everything lane/sublane-dense in the wrapper; padded vocab rows are
    # never selected (token ids < V) and padded feature cols stay exactly zero.
    ids_p = jnp.pad(ids, ((0, B_pad - B), (0, 0)))                   # (B_pad, S)
    emb_p = jnp.pad(emb, ((0, V_pad - V), (0, E_pad - E))).astype(matmul_dtype)
    w1_p = jnp.pad(w1, ((0, E_pad - E), (0, H_pad - H))).astype(matmul_dtype)
    b1_p = jnp.pad(b1, ((0, 0), (0, H_pad - H)))
    w2_p = jnp.pad(w2, ((0, H_pad - H), (0, O_pad - O))).astype(matmul_dtype)
    b2_p = jnp.pad(b2, ((0, 0), (0, O_pad - O)))

    kernel = functools.partial(mlp_bow_kernel, num_classes=O)

    out_padded = pl.pallas_call(
        kernel,
        out_shape=jax.ShapeDtypeStruct((B_pad, O_pad), jnp.float32),
        grid=(B_pad // Bt,),
        in_specs=[
            pl.BlockSpec((Bt, S), lambda i: (i, 0)),          # token ids (lane-dense)
            pl.BlockSpec((V_pad, E_pad), lambda i: (0, 0)),   # embedding table
            pl.BlockSpec((E_pad, H_pad), lambda i: (0, 0)),   # W1
            pl.BlockSpec((1, H_pad), lambda i: (0, 0)),       # b1
            pl.BlockSpec((H_pad, O_pad), lambda i: (0, 0)),   # W2
            pl.BlockSpec((1, O_pad), lambda i: (0, 0)),       # b2
        ],
        out_specs=pl.BlockSpec((Bt, O_pad), lambda i: (i, 0)),
        compiler_params=pltpu.CompilerParams(
            dimension_semantics=("parallel",),   # batch tiles shard across TCs (v7x)
        ),
    )(ids_p, emb_p, w1_p, b1_p, w2_p, b2_p)

    return out_padded[:B, :O]


def mlp_reference(ids, emb, w1, b1, w2, b2):
    x = emb[ids].mean(axis=1)
    h = jnp.maximum(x @ w1 + b1, 0.0)
    o = h @ w2 + b2
    return jax.nn.softmax(o, axis=1)


if __name__ == "__main__":
    # Small shapes consistent with the module's forward.
    vocab_size, embedding_dim, hidden_dim, output_dim = 32, 16, 32, 8
    batch, seq = 2, 8

    key = jax.random.PRNGKey(0)
    k_ids, k_emb, k_w1, k_b1, k_w2, k_b2 = jax.random.split(key, 6)

    ids = jax.random.randint(k_ids, (batch, seq), 0, vocab_size, dtype=jnp.int32)
    emb = jax.random.normal(k_emb, (vocab_size, embedding_dim), dtype=jnp.float32)
    # nn.Linear-style init (uniform in +-1/sqrt(fan_in)); weights stored as (in, out).
    w1 = jax.random.uniform(k_w1, (embedding_dim, hidden_dim), jnp.float32,
                            -1.0 / embedding_dim ** 0.5, 1.0 / embedding_dim ** 0.5)
    b1 = jax.random.uniform(k_b1, (1, hidden_dim), jnp.float32,
                            -1.0 / embedding_dim ** 0.5, 1.0 / embedding_dim ** 0.5)
    w2 = jax.random.uniform(k_w2, (hidden_dim, output_dim), jnp.float32,
                            -1.0 / hidden_dim ** 0.5, 1.0 / hidden_dim ** 0.5)
    b2 = jax.random.uniform(k_b2, (1, output_dim), jnp.float32,
                            -1.0 / hidden_dim ** 0.5, 1.0 / hidden_dim ** 0.5)

    probs = jax.block_until_ready(mlp_forward(ids, emb, w1, b1, w2, b2))
    ref = jax.block_until_ready(mlp_reference(ids, emb, w1, b1, w2, b2))

    assert probs.shape == (batch, output_dim)
    assert jnp.allclose(probs, ref, atol=1e-3, rtol=1e-3), (probs, ref)
    assert jnp.allclose(probs.sum(axis=1), 1.0, atol=1e-5)
    print("KERNEL_OK")
</pallas_src>

<mosaic_0001>
module attributes {stable_mosaic.version = 11 : i64} {
  func.func @mlp_bow_kernel(%arg0: i32, %arg1: memref<8x8xi32, #tpu.memory_space<vmem>>, %arg2: memref<128x128xf32, #tpu.memory_space<vmem>>, %arg3: memref<128x128xf32, #tpu.memory_space<vmem>>, %arg4: memref<1x128xf32, #tpu.memory_space<vmem>>, %arg5: memref<128x128xf32, #tpu.memory_space<vmem>>, %arg6: memref<1x128xf32, #tpu.memory_space<vmem>>, %arg7: memref<8x128xf32, #tpu.memory_space<vmem>>) attributes {dimension_semantics = [#tpu.dimension_semantics<parallel>], iteration_bounds = array<i64: 1>, scalar_prefetch = 0 : i64, scratch_operands = 0 : i64, tpu.core_type = #tpu.core_type<tc>, window_params = [{transform_indices = @transform_0, window_bounds = array<i64: 8, 8>}, {pipeline_mode = #tpu.pipeline_mode<synchronous>, transform_indices = @transform_1, window_bounds = array<i64: 128, 128>}, {pipeline_mode = #tpu.pipeline_mode<synchronous>, transform_indices = @transform_2, window_bounds = array<i64: 128, 128>}, {pipeline_mode = #tpu.pipeline_mode<synchronous>, transform_indices = @transform_3, window_bounds = array<i64: 1, 128>}, {pipeline_mode = #tpu.pipeline_mode<synchronous>, transform_indices = @transform_4, window_bounds = array<i64: 128, 128>}, {pipeline_mode = #tpu.pipeline_mode<synchronous>, transform_indices = @transform_5, window_bounds = array<i64: 1, 128>}, {transform_indices = @transform_6, window_bounds = array<i64: 8, 128>}]} {
    %0 = tpu.iota {dimensions = array<i32: 1>} : vector<8x128xi32>
    %cst = arith.constant 0.000000e+00 : f32
    %1 = vector.broadcast %cst : f32 to vector<8x128xf32>
    %c0 = arith.constant 0 : index
    %c0_0 = arith.constant 0 : index
    %2 = vector.load %arg1[%c0, %c0_0] : memref<8x8xi32, #tpu.memory_space<vmem>>, vector<8x1xi32>
    %3 = vector.broadcast %2 : vector<8x1xi32> to vector<8x128xi32>
    %4 = arith.cmpi eq, %0, %3 : vector<8x128xi32>
    %5 = arith.extui %4 : vector<8x128xi1> to vector<8x128xi32>
    %6 = arith.sitofp %5 : vector<8x128xi32> to vector<8x128xf32>
    %7 = arith.addf %1, %6 : vector<8x128xf32>
    %c0_1 = arith.constant 0 : index
    %c1 = arith.constant 1 : index
    %8 = vector.load %arg1[%c0_1, %c1] : memref<8x8xi32, #tpu.memory_space<vmem>>, vector<8x1xi32>
    %9 = vector.broadcast %8 : vector<8x1xi32> to vector<8x128xi32>
    %10 = arith.cmpi eq, %0, %9 : vector<8x128xi32>
    %11 = arith.extui %10 : vector<8x128xi1> to vector<8x128xi32>
    %12 = arith.sitofp %11 : vector<8x128xi32> to vector<8x128xf32>
    %13 = arith.addf %7, %12 : vector<8x128xf32>
    %c0_2 = arith.constant 0 : index
    %c2 = arith.constant 2 : index
    %14 = vector.load %arg1[%c0_2, %c2] : memref<8x8xi32, #tpu.memory_space<vmem>>, vector<8x1xi32>
    %15 = vector.broadcast %14 : vector<8x1xi32> to vector<8x128xi32>
    %16 = arith.cmpi eq, %0, %15 : vector<8x128xi32>
    %17 = arith.extui %16 : vector<8x128xi1> to vector<8x128xi32>
    %18 = arith.sitofp %17 : vector<8x128xi32> to vector<8x128xf32>
    %19 = arith.addf %13, %18 : vector<8x128xf32>
    %c0_3 = arith.constant 0 : index
    %c3 = arith.constant 3 : index
    %20 = vector.load %arg1[%c0_3, %c3] : memref<8x8xi32, #tpu.memory_space<vmem>>, vector<8x1xi32>
    %21 = vector.broadcast %20 : vector<8x1xi32> to vector<8x128xi32>
    %22 = arith.cmpi eq, %0, %21 : vector<8x128xi32>
    %23 = arith.extui %22 : vector<8x128xi1> to vector<8x128xi32>
    %24 = arith.sitofp %23 : vector<8x128xi32> to vector<8x128xf32>
    %25 = arith.addf %19, %24 : vector<8x128xf32>
    %c0_4 = arith.constant 0 : index
    %c4 = arith.constant 4 : index
    %26 = vector.load %arg1[%c0_4, %c4] : memref<8x8xi32, #tpu.memory_space<vmem>>, vector<8x1xi32>
    %27 = vector.broadcast %26 : vector<8x1xi32> to vector<8x128xi32>
    %28 = arith.cmpi eq, %0, %27 : vector<8x128xi32>
    %29 = arith.extui %28 : vector<8x128xi1> to vector<8x128xi32>
    %30 = arith.sitofp %29 : vector<8x128xi32> to vector<8x128xf32>
    %31 = arith.addf %25, %30 : vector<8x128xf32>
    %c0_5 = arith.constant 0 : index
    %c5 = arith.constant 5 : index
    %32 = vector.load %arg1[%c0_5, %c5] : memref<8x8xi32, #tpu.memory_space<vmem>>, vector<8x1xi32>
    %33 = vector.broadcast %32 : vector<8x1xi32> to vector<8x128xi32>
    %34 = arith.cmpi eq, %0, %33 : vector<8x128xi32>
    %35 = arith.extui %34 : vector<8x128xi1> to vector<8x128xi32>
    %36 = arith.sitofp %35 : vector<8x128xi32> to vector<8x128xf32>
    %37 = arith.addf %31, %36 : vector<8x128xf32>
    %c0_6 = arith.constant 0 : index
    %c6 = arith.constant 6 : index
    %38 = vector.load %arg1[%c0_6, %c6] : memref<8x8xi32, #tpu.memory_space<vmem>>, vector<8x1xi32>
    %39 = vector.broadcast %38 : vector<8x1xi32> to vector<8x128xi32>
    %40 = arith.cmpi eq, %0, %39 : vector<8x128xi32>
    %41 = arith.extui %40 : vector<8x128xi1> to vector<8x128xi32>
    %42 = arith.sitofp %41 : vector<8x128xi32> to vector<8x128xf32>
    %43 = arith.addf %37, %42 : vector<8x128xf32>
    %c0_7 = arith.constant 0 : index
    %c7 = arith.constant 7 : index
    %44 = vector.load %arg1[%c0_7, %c7] : memref<8x8xi32, #tpu.memory_space<vmem>>, vector<8x1xi32>
    %45 = vector.broadcast %44 : vector<8x1xi32> to vector<8x128xi32>
    %46 = arith.cmpi eq, %0, %45 : vector<8x128xi32>
    %47 = arith.extui %46 : vector<8x128xi1> to vector<8x128xi32>
    %48 = arith.sitofp %47 : vector<8x128xi32> to vector<8x128xf32>
    %49 = arith.addf %43, %48 : vector<8x128xf32>
    %c0_8 = arith.constant 0 : index
    %c0_9 = arith.constant 0 : index
    %50 = vector.load %arg2[%c0_8, %c0_9] : memref<128x128xf32, #tpu.memory_space<vmem>>, vector<128x128xf32>
    %cst_10 = arith.constant dense<0.000000e+00> : vector<8x128xf32>
    %51 = tpu.matmul %49, %50, %cst_10 {dimension_numbers = #tpu.dot_dimension_numbers<[1], [0], [0], [1], [0, 0, 1, 1], [], []>} : vector<8x128xf32>, vector<128x128xf32>, vector<8x128xf32> -> vector<8x128xf32>
    %cst_11 = arith.constant 1.250000e-01 : f32
    %52 = vector.broadcast %cst_11 : f32 to vector<8x128xf32>
    %53 = arith.mulf %51, %52 : vector<8x128xf32>
    %c0_12 = arith.constant 0 : index
    %c0_13 = arith.constant 0 : index
    %54 = vector.load %arg3[%c0_12, %c0_13] : memref<128x128xf32, #tpu.memory_space<vmem>>, vector<128x128xf32>
    %cst_14 = arith.constant dense<0.000000e+00> : vector<8x128xf32>
    %55 = tpu.matmul %53, %54, %cst_14 {dimension_numbers = #tpu.dot_dimension_numbers<[1], [0], [0], [1], [0, 0, 1, 1], [], []>} : vector<8x128xf32>, vector<128x128xf32>, vector<8x128xf32> -> vector<8x128xf32>
    %c0_15 = arith.constant 0 : index
    %c0_16 = arith.constant 0 : index
    %56 = vector.load %arg4[%c0_15, %c0_16] : memref<1x128xf32, #tpu.memory_space<vmem>>, vector<1x128xf32>
    %57 = vector.broadcast %56 : vector<1x128xf32> to vector<8x128xf32>
    %58 = arith.addf %55, %57 : vector<8x128xf32>
    %cst_17 = arith.constant 0.000000e+00 : f32
    %59 = vector.broadcast %cst_17 : f32 to vector<8x128xf32>
    %60 = arith.maximumf %58, %59 : vector<8x128xf32>
    %c0_18 = arith.constant 0 : index
    %c0_19 = arith.constant 0 : index
    %61 = vector.load %arg5[%c0_18, %c0_19] : memref<128x128xf32, #tpu.memory_space<vmem>>, vector<128x128xf32>
    %cst_20 = arith.constant dense<0.000000e+00> : vector<8x128xf32>
    %62 = tpu.matmul %60, %61, %cst_20 {dimension_numbers = #tpu.dot_dimension_numbers<[1], [0], [0], [1], [0, 0, 1, 1], [], []>} : vector<8x128xf32>, vector<128x128xf32>, vector<8x128xf32> -> vector<8x128xf32>
    %c0_21 = arith.constant 0 : index
    %c0_22 = arith.constant 0 : index
    %63 = vector.load %arg6[%c0_21, %c0_22] : memref<1x128xf32, #tpu.memory_space<vmem>>, vector<1x128xf32>
    %64 = vector.broadcast %63 : vector<1x128xf32> to vector<8x128xf32>
    %65 = arith.addf %62, %64 : vector<8x128xf32>
    %66 = tpu.iota {dimensions = array<i32: 1>} : vector<8x128xi32>
    %c8_i32 = arith.constant 8 : i32
    %67 = vector.broadcast %c8_i32 : i32 to vector<8x128xi32>
    %68 = arith.cmpi slt, %66, %67 : vector<8x128xi32>
    %cst_23 = arith.constant -1.000000e+30 : f32
    %69 = vector.broadcast %cst_23 : f32 to vector<8x128xf32>
    %70 = arith.select %68, %65, %69 : vector<8x128xi1>, vector<8x128xf32>
    %cst_24 = arith.constant dense<0xFF800000> : vector<8xf32>
    %71 = vector.multi_reduction <maximumf>, %70, %cst_24 [1] : vector<8x128xf32> to vector<8xf32>
    %72 = vector.shape_cast %71 : vector<8xf32> to vector<8x1xf32>
    %73 = vector.broadcast %72 : vector<8x1xf32> to vector<8x128xf32>
    %74 = arith.subf %70, %73 : vector<8x128xf32>
    %75 = math.exp %74 : vector<8x128xf32>
    %cst_25 = arith.constant dense<0.000000e+00> : vector<8xf32>
    %76 = vector.multi_reduction <add>, %75, %cst_25 [1] : vector<8x128xf32> to vector<8xf32>
    %77 = vector.shape_cast %76 : vector<8xf32> to vector<8x1xf32>
    %78 = vector.broadcast %77 : vector<8x1xf32> to vector<8x128xf32>
    %79 = arith.divf %75, %78 : vector<8x128xf32>
    %c0_26 = arith.constant 0 : index
    %c0_27 = arith.constant 0 : index
    %80 = vector.load %arg7[%c0_26, %c0_27] : memref<8x128xf32, #tpu.memory_space<vmem>>, vector<8x128xf32>
    tpu.vector_store %arg7[%c0_26, %c0_27], %79 {strides = array<i32>} : memref<8x128xf32, #tpu.memory_space<vmem>>, vector<8x128xf32>,
    return
  }
  func.func @transform_0(%arg0: i32) -> (i32, i32) {
    %c0_i32 = arith.constant 0 : i32
    %c0_i32_0 = arith.constant 0 : i32
    return %arg0, %c0_i32 : i32, i32
  }
  func.func @transform_1(%arg0: i32) -> (i32, i32) {
    %c0_i32 = arith.constant 0 : i32
    %c0_i32_0 = arith.constant 0 : i32
    %c0_i32_1 = arith.constant 0 : i32
    return %c0_i32, %c0_i32_0 : i32, i32
  }
  func.func @transform_2(%arg0: i32) -> (i32, i32) {
    %c0_i32 = arith.constant 0 : i32
    %c0_i32_0 = arith.constant 0 : i32
    %c0_i32_1 = arith.constant 0 : i32
    return %c0_i32, %c0_i32_0 : i32, i32
  }
  func.func @transform_3(%arg0: i32) -> (i32, i32) {
    %c0_i32 = arith.constant 0 : i32
    %c0_i32_0 = arith.constant 0 : i32
    %c0_i32_1 = arith.constant 0 : i32
    return %c0_i32, %c0_i32_0 : i32, i32
  }
  func.func @transform_4(%arg0: i32) -> (i32, i32) {
    %c0_i32 = arith.constant 0 : i32
    %c0_i32_0 = arith.constant 0 : i32
    %c0_i32_1 = arith.constant 0 : i32
    return %c0_i32, %c0_i32_0 : i32, i32
  }
  func.func @transform_5(%arg0: i32) -> (i32, i32) {
    %c0_i32 = arith.constant 0 : i32
    %c0_i32_0 = arith.constant 0 : i32
    %c0_i32_1 = arith.constant 0 : i32
    return %c0_i32, %c0_i32_0 : i32, i32
  }
  func.func @transform_6(%arg0: i32) -> (i32, i32) {
    %c0_i32 = arith.constant 0 : i32
    %c0_i32_0 = arith.constant 0 : i32
    return %arg0, %c0_i32 : i32, i32
  }
}

</mosaic_0001>

<bundles_post_ra>
// kernel: tpu_custom_call.1
= control target key start
LH: loop header
LB: loop body
LE: loop exit
PB: predicated region body
PF: predicated region fallthrough
CT: control target
= control target key end

     0   :  { %11 = vsyncpa [#allocation3], 0  ;;  %s556_s0 = inlined_call_operand.hbm [shape: s32[8,8], index: 0, kind: input, shape index: {}]   ;;  %s557_s1 = inlined_call_operand.hbm [shape: f32[128,128], index: 1, kind: input, shape index: {}]   ;;  %s558_s2 = inlined_call_operand.hbm [shape: f32[128,128], index: 2, kind: input, shape index: {}]   ;;  %s559_s3 = inlined_call_operand.vmem [shape: f32[1,128], index: 3, kind: input, shape index: {}]   ;;  %s560_s4 = inlined_call_operand.hbm [shape: f32[128,128], index: 4, kind: input, shape index: {}]   ;;  %s561_s5 = inlined_call_operand.vmem [shape: f32[1,128], index: 5, kind: input, shape index: {}]   ;;  %s562_s6 = inlined_call_operand.hbm [shape: f32[8,128], index: 6, kind: output, shape index: {}]  }
   0x1   :  { %12 = vsyncpa [#allocation6], 0 }
   0x2   :  { %13 = vsyncpa [#allocation9], 0  ;;  %s30_s23 = sshll.u32 %s557_s1, 4  ;;  %s31_s23 = int_to_ptr.hbm [resolvable:$true] %s30_s23 }
   0x3   :  { %14 = vsyncpa [#allocation4], 0  ;;  %s473_s24 = smov [#allocation5]   ;;  %s20_s28 = sshll.u32 %s556_s0, 4  ;;  %s21_s28 = int_to_ptr.hbm [resolvable:$true] %s20_s28 }
   0x4   :  { %s32_s25 = sshll.u32 %s473_s24, 4  ;;  %s474_s29 = smov 128   ;;  %s33_s25 = int_to_ptr.vmem [resolvable:$true] %s32_s25 }
   0x5   :  { %s475_s30 = smov 8   ;;  %s476_s7 = smov [#allocation2]  }
   0x6   :  { %38 = dma.hbm_to_vmem [thread:$0]  %s31_s23, 2048, %s33_s25, [#allocation6], %s474_s29, %s474_s29, %s475_s30  }
   0x7   :  { %s22_s8 = sshll.u32 %s476_s7, 4  ;;  %s43_s11 = sshll.u32 %s558_s2, 4  ;;  %s23_s8 = int_to_ptr.vmem [resolvable:$true] %s22_s8  ;;  %s44_s11 = int_to_ptr.hbm [resolvable:$true] %s43_s11 }
   0x8   :  { %25 = dma.hbm_to_vmem [thread:$0]  %s21_s28, 128, %s23_s8, [#allocation3]  }
   0x9   :  { %s58_s13 = sshll.u32 %s560_s4, 4  ;;  %s477_s14 = smov [#allocation7]   ;;  %s59_s13 = int_to_ptr.hbm [resolvable:$true] %s58_s13 }
   0xa   :  { %s45_s15 = sshll.u32 %s477_s14, 4  ;;  %s478_s0 = smov [#allocation8]   ;;  %s46_s15 = int_to_ptr.vmem [resolvable:$true] %s45_s15 }
   0xb   :  { %51 = dma.hbm_to_vmem [thread:$0]  %s44_s11, 2048, %s46_s15, [#allocation6], %s474_s29, %s474_s29, %s475_s30  }
   0xc   :  { %s60_s16 = sshll.u32 %s478_s0, 4  ;;  %s61_s16 = int_to_ptr.vmem [resolvable:$true] %s60_s16 }
   0xd   :  { %66 = dma.hbm_to_vmem [thread:$0]  %s59_s13, 2048, %s61_s16, [#allocation9], %s474_s29, %s474_s29, %s475_s30  }
   0xe   :  { %465 = dma.done.wait [#allocation3], 128  }
   0xf   :  { %466 = vsyncadd [#allocation3], 4294967168 }
  0x10   :  { %467 = dma.done.wait [#allocation6], 4096  }
  0x11   :  { %468 = vsyncadd [#allocation6], 4294963200 }
  0x12   :  { %469 = dma.done.wait [#allocation9], 2048  }
  0x13   :  { %470 = vsyncadd [#allocation9], 4294965248  ;;  %v479_v0 = vmov 0   ;;  %v480_v1 = vmov 2   ;;  %v481_v2 = vmov 4   ;;  %v87_v3 = vld [vmem:[#allocation2] sm:$0xff]  ;;  %v85_v30 = vlaneseq }
  0x14   :  { %330 = vset.pattern.permute.xlu0 %v479_v0  ;;  %332 = vset.pattern.permute.xlu1 %v480_v1  ;;  %v159_v4 = vld [vmem:[#allocation5 + $0x78] sm:$0xff]  ;;  %v158_v5 = vld [vmem:[#allocation5 + $0x70] sm:$0xff]  ;;  %v157_v6 = vld [vmem:[#allocation5 + $0x68] sm:$0xff]  ;;  %v482_v7 = vmov 1   ;;  %v483_v8 = vmov 3   ;;  %v484_v9 = vmov 5  }
  0x15   :  { %334 = vset.pattern.permute.xlu2 %v481_v2  ;;  %89 = vperm.xlu0 %330, %v87_v3   ;;  %v485_v10 = vmov 6   ;;  %v486_v11 = vmov 7   ;;  %v156_v12 = vld [vmem:[#allocation5 + $0x60] sm:$0xff]  ;;  %v155_v13 = vld [vmem:[#allocation5 + $0x58] sm:$0xff]  ;;  %v154_v14 = vld [vmem:[#allocation5 + $0x50] sm:$0xff]  ;;  %v536_v35 = vand.u32 127, %v85_v30 }
  0x16   :  { %103 = vperm.xlu1 %332, %v87_v3   ;;  %117 = vperm.xlu2 %334, %v87_v3   ;;  %v153_v15 = vld [vmem:[#allocation5 + $0x48] sm:$0xff]  ;;  %v152_v16 = vld [vmem:[#allocation5 + $0x40] sm:$0xff]  ;;  %v151_v17 = vld [vmem:[#allocation5 + $0x38] sm:$0xff]  ;;  %v487_v43 = vmov 0.0   ;;  %s294_s21 = sshll.u32 %s562_s6, 4  ;;  %s295_s21 = int_to_ptr.hbm [resolvable:$true] %s294_s21 }
  0x17   :  { %160 = vmatpush.msra.mxu0 %v159_v4  ;;  %v150_v18 = vld [vmem:[#allocation5 + $0x30] sm:$0xff]  ;;  %v149_v19 = vld [vmem:[#allocation5 + $0x28] sm:$0xff]  ;;  %v148_v20 = vld [vmem:[#allocation5 + $0x20] sm:$0xff]  ;;  %vm262_vm8 = vcmp.lt.s32.totalorder %v536_v35, 8 }
  0x18   :  { %v147_v21 = vld [vmem:[#allocation5 + $0x18] sm:$0xff]  ;;  %v146_v22 = vld [vmem:[#allocation5 + $0x10] sm:$0xff]  ;;  %v145_v23 = vld [vmem:[#allocation5 + $0x8] sm:$0xff] }
  0x19   :  { %161 = vmatpush.msra.mxu0 %v158_v5  ;;  %v144_v24 = vld [vmem:[#allocation5] sm:$0xff]  ;;  %v196_v25 = vld [vmem:[#allocation7 + $0x78] sm:$0xff]  ;;  %v195_v26 = vld [vmem:[#allocation7 + $0x70] sm:$0xff] }
  0x1a   :  { %201 = vmatpush.msra.mxu1 %v196_v25  ;;  %v194_v28 = vld [vmem:[#allocation7 + $0x68] sm:$0xff]  ;;  %v193_v29 = vld [vmem:[#allocation7 + $0x60] sm:$0xff]  ;;  %v192_v33 = vld [vmem:[#allocation7 + $0x58] sm:$0xff] }
  0x1b   :  { %162 = vmatpush.msra.mxu0 %v157_v6  ;;  %v191_v34 = vld [vmem:[#allocation7 + $0x50] sm:$0xff]  ;;  %v190_v36 = vld [vmem:[#allocation7 + $0x48] sm:$0xff]  ;;  %v189_v38 = vld [vmem:[#allocation7 + $0x40] sm:$0xff] }
  0x1c   :  { %202 = vmatpush.msra.mxu1 %v195_v26  ;;  %v188_v39 = vld [vmem:[#allocation7 + $0x38] sm:$0xff]  ;;  %v187_v42 = vld [vmem:[#allocation7 + $0x30] sm:$0xff]  ;;  %v186_v47 = vld [vmem:[#allocation7 + $0x28] sm:$0xff] }
  0x1d   :  { %331 = vset.pattern.permute.xlu0 %v482_v7  ;;  %163 = vmatpush.msra.mxu0 %v156_v12  ;;  %v185_v50 = vld [vmem:[#allocation7 + $0x20] sm:$0xff]  ;;  %v184_v54 = vld [vmem:[#allocation7 + $0x18] sm:$0xff]  ;;  %v183_v58 = vld [vmem:[#allocation7 + $0x10] sm:$0xff] }
  0x1e   :  { %333 = vset.pattern.permute.xlu1 %v483_v8  ;;  %96 = vperm.xlu0 %331, %v87_v3   ;;  %v182_v1 = vld [vmem:[#allocation7 + $0x8] sm:$0xff]  ;;  %v181_v2 = vld [vmem:[#allocation7] sm:$0xff]  ;;  %v236_v4 = vld [vmem:[#allocation8 + $0x70] sm:$0xff] }
  0x1f   :  { %110 = vperm.xlu1 %333, %v87_v3   ;;  %335 = vset.pattern.permute.xlu2 %v484_v9  ;;  %v235_v5 = vld [vmem:[#allocation8 + $0x68] sm:$0xff]  ;;  %v234_v6 = vld [vmem:[#allocation8 + $0x60] sm:$0xff]  ;;  %v233_v7 = vld [vmem:[#allocation8 + $0x58] sm:$0xff] }
  0x20   :  { %124 = vperm.xlu2 %335, %v87_v3   ;;  %164 = vmatpush.msra.mxu0 %v155_v13  ;;  %v232_v8 = vld [vmem:[#allocation8 + $0x50] sm:$0xff]  ;;  %v231_v9 = vld [vmem:[#allocation8 + $0x48] sm:$0xff]  ;;  %v340_v25 = vld [vmem:[%s561_s5] ss:$0 sm:$0xff] }
  0x21   :  { %203 = vmatpush.msra.mxu1 %v194_v28  ;;  %v228_v12 = vld [vmem:[#allocation8 + $0x30] sm:$0xff]  ;;  %v227_v13 = vld [vmem:[#allocation8 + $0x28] sm:$0xff] }
  0x22   :  { %165 = vmatpush.msra.mxu0 %v154_v14  ;;  %v226_v14 = vld [vmem:[#allocation8 + $0x20] sm:$0xff] }
  0x23   :  { %204 = vmatpush.msra.mxu1 %v193_v29 }
  0x24   :  { %166 = vmatpush.msra.mxu0 %v153_v15  ;;  %v225_v15 = vld [vmem:[#allocation8 + $0x18] sm:$0xff] }
  0x25   :  { %205 = vmatpush.msra.mxu1 %v192_v33 }
  0x26   :  { %338 = vset.pattern.permute.xlu0 %v486_v11  ;;  %167 = vmatpush.msra.mxu0 %v152_v16 }
  0x27   :  { %336 = vset.pattern.permute.xlu1 %v485_v10  ;;  %206 = vmatpush.msra.mxu1 %v191_v34  ;;  %v230_v10 = vld [vmem:[#allocation8 + $0x40] sm:$0xff] }
  0x28   :  { %131 = vperm.xlu1 %336, %v87_v3   ;;  %337 = vset.pattern.permute.xlu2 %v486_v11  ;;  %v229_v11 = vld [vmem:[#allocation8 + $0x38] sm:$0xff] }
  0x29   :  { %138 = vperm.xlu2 %337, %v87_v3   ;;  %168 = vmatpush.msra.mxu0 %v151_v17  ;;  %v237_v3 = vld [vmem:[#allocation8 + $0x78] sm:$0xff] }
  0x2a   :  { %207 = vmatpush.msra.mxu1 %v190_v36  ;;  %242 = vmatpush.msra.mxu2 %v237_v3 }
  0x2b   :  { %169 = vmatpush.msra.mxu0 %v150_v18  ;;  %v224_v18 = vld [vmem:[#allocation8 + $0x10] sm:$0xff] }
  0x2c   :  { %208 = vmatpush.msra.mxu1 %v189_v38  ;;  %243 = vmatpush.msra.mxu2 %v236_v4 }
  0x2d   :  { %170 = vmatpush.msra.mxu0 %v149_v19  ;;  %v223_v19 = vld [vmem:[#allocation8 + $0x8] sm:$0xff] }
  0x2e   :  { %209 = vmatpush.msra.mxu1 %v188_v39  ;;  %244 = vmatpush.msra.mxu2 %v235_v5 }
  0x2f   :  { %171 = vmatpush.msra.mxu0 %v148_v20  ;;  %v222_v20 = vld [vmem:[#allocation8] sm:$0xff] }
  0x30   :  { %210 = vmatpush.msra.mxu1 %v187_v42  ;;  %245 = vmatpush.msra.mxu2 %v234_v6 }
  0x31   :  { %172 = vmatpush.msra.mxu0 %v147_v21  ;;  %v339_v21 = vld [vmem:[%s559_s3] ss:$0 sm:$0xff]  ;;  %s488_s3 = smov [#allocation10]  }
  0x32   :  { %211 = vmatpush.msra.mxu1 %v186_v47  ;;  %246 = vmatpush.msra.mxu2 %v233_v7  ;;  %s292_s5 = sshll.u32 %s488_s3, 4  ;;  %s293_s5 = int_to_ptr.vmem [resolvable:$true] %s292_s5 }
  0x33   :  { %173 = vmatpush.msra.mxu0 %v146_v22 }
  0x34   :  { %212 = vmatpush.msra.mxu1 %v185_v50  ;;  %247 = vmatpush.msra.mxu2 %v232_v8 }
  0x35   :  { %174 = vmatpush.msra.mxu0 %v145_v23 }
  0x36   :  { %213 = vmatpush.msra.mxu1 %v184_v54  ;;  %248 = vmatpush.msra.mxu2 %v231_v9 }
  0x37   :  { %175 = vmatpush.msra.mxu0 %v144_v24 }
  0x38   :  { %214 = vmatpush.msra.mxu1 %v183_v58  ;;  %249 = vmatpush.msra.mxu2 %v230_v10 }
  0x3a   :  { %215 = vmatpush.msra.mxu1 %v182_v1  ;;  %250 = vmatpush.msra.mxu2 %v229_v11 }
  0x3c   :  { %216 = vmatpush.msra.mxu1 %v181_v2  ;;  %251 = vmatpush.msra.mxu2 %v228_v12 }
  0x3e   :  { %252 = vmatpush.msra.mxu2 %v227_v13 }
  0x40   :  { %253 = vmatpush.msra.mxu2 %v226_v14 }
  0x42   :  { %254 = vmatpush.msra.mxu2 %v225_v15 }
  0x44   :  { %255 = vmatpush.msra.mxu2 %v224_v18 }
  0x46   :  { %256 = vmatpush.msra.mxu2 %v223_v19 }
  0x48   :  { %257 = vmatpush.msra.mxu2 %v222_v20 }
  0x70   :  { %v118_v27 = vpop.permute.xlu2 %117 }
  0x71   :  { %vm119_vm4 = vcmp.eq.s32.totalorder %v536_v35, %v118_v27 }
  0x72   :  { %v310_v55 = vsel %vm119_vm4, 1.0, %v487_v43 }
  0x7a   :  { %v125_v37 = vpop.permute.xlu2 %124 }
  0x7b   :  { %vm126_vm5 = vcmp.eq.s32.totalorder %v536_v35, %v125_v37 }
  0x7c   :  { %v311_v59 = vsel %vm126_vm5, 1.0, %v487_v43 }
  0x83   :  { %v139_v52 = vpop.permute.xlu2 %138 }
  0x84   :  { %vm140_vm6 = vcmp.eq.s32.totalorder %v536_v35, %v139_v52 }
  0x85   :  { %v313_v62 = vsel %vm140_vm6, 1.0, %v487_v43 }
  0x87   :  { %v90_v31 = vpop.permute.xlu0 %89 }
  0x88   :  { %v104_v32 = vpop.permute.xlu1 %103  ;;  %vm91_vm0 = vcmp.eq.s32.totalorder %v536_v35, %v90_v31 }
  0x89   :  { %vm105_vm1 = vcmp.eq.s32.totalorder %v536_v35, %v104_v32  ;;  %v306_v44 = vsel %vm91_vm0, 1.0, %v487_v43 }
  0x8a   :  { %v308_v48 = vsel %vm105_vm1, 1.0, %v487_v43 }
  0x90   :  { %v97_v40 = vpop.permute.xlu0 %96 }
  0x91   :  { %v111_v41 = vpop.permute.xlu1 %110  ;;  %vm98_vm2 = vcmp.eq.s32.totalorder %v536_v35, %v97_v40 }
  0x92   :  { %v307_v45 = vsel %vm98_vm2, 1.0, %v487_v43  ;;  %vm112_vm3 = vcmp.eq.s32.totalorder %v536_v35, %v111_v41 }
  0x93   :  { %v101_v46 = vadd.f32 %v307_v45, %v306_v44  ;;  %v309_v51 = vsel %vm112_vm3, 1.0, %v487_v43 }
  0x95   :  { %v108_v49 = vadd.f32 %v308_v48, %v101_v46 }
  0x97   :  { %v115_v53 = vadd.f32 %v309_v51, %v108_v49 }
  0x99   :  { %v122_v56 = vadd.f32 %v310_v55, %v115_v53 }
  0x9a   :  { %v132_v57 = vpop.permute.xlu1 %131 }
  0x9b   :  { %vm133_vm7 = vcmp.eq.s32.totalorder %v536_v35, %v132_v57  ;;  %v129_v60 = vadd.f32 %v311_v59, %v122_v56 }
  0x9c   :  { %v312_v61 = vsel %vm133_vm7, 1.0, %v487_v43 }
  0x9d   :  { %v136_v63 = vadd.f32 %v312_v61, %v129_v60 }
  0x9f   :  { %v143_v0 = vadd.f32 %v313_v62, %v136_v63 }
  0xa1   :  { %176 = vmatmul.f32.vlgmr.msra.gmra.mxu0 %v143_v0 }
 0x11e   :  { %v177_v16 = vpop.f32.mrf.mxu0 }
 0x11f   :  { %v180_v17 = vmul.f32 0.125, %v177_v16 }
 0x121   :  { %217 = vmatmul.f32.vlgmr.msra.gmra.mxu1 %v180_v17 }
 0x19e   :  { %v218_v22 = vpop.f32.mrf.mxu1 }
 0x19f   :  { %v219_v23 = vadd.f32 %v339_v21, %v218_v22 }
 0x1a1   :  { %v221_v24 = vmax.f32 %v219_v23, 0.0 }
 0x1a3   :  { %258 = vmatmul.f32.vlgmr.msra.gmra.mxu2 %v221_v24 }
 0x226   :  { %v259_v26 = vpop.f32.mrf.mxu2 }
 0x227   :  { %v260_v27 = vadd.f32 %v340_v25, %v259_v26 }
 0x229   :  { %v263_v28 = vsel %vm262_vm8, %v260_v27, -1e+30 }
 0x22a   :  { %264 = vmax.xlane.f32.xlu0 %v263_v28 }
 0x29d   :  { %v265_v29 = vpop.xlane.xlu0 %264 }
 0x29e   :  { %v266_v30 = vsub.f32 %v263_v28, %v265_v29 }
 0x2a0   :  { %v267_v31 = vmul.f32 1.442695, %v266_v30 }
 0x2a2   :  { %341 = vpow2.f32 %v267_v31 }
 0x2a8   :  { %v342_v32 = vpop.eup %341 }
 0x2a9   :  { %269 = vadd.xlane.f32.xlu1 %v342_v32 }
 0x31c   :  { %v270_v33 = vpop.xlane.xlu1 %269 }
 0x31d   :  { %343 = vrcp.f32 %v270_v33  ;;  %v282_v38 = vand.u32 2147483648, %v270_v33  ;;  %v280_v40 = vand.u32 2147483647, %v270_v33  ;;  %vm276_vm10 = vweird.f32 %v270_v33 }
 0x31f   :  { %v283_v35 = vor.u32 1.1754944e-38, %v282_v38  ;;  %vm281_vm12 = vcmp.eq.f32.partialorder %v280_v40, 8.507059e+37 }
 0x323   :  { %v344_v34 = vpop.eup %343 }
 0x324   :  { %v272_v36 = vmul.f32 %v344_v34, %v270_v33  ;;  %vm277_vm9 = vweird.f32 %v344_v34 }
 0x325   :  { %vm278_vm11 = vmor %vm276_vm10, %vm277_vm9 }
 0x326   :  { %v273_v37 = vsub.f32 1.0, %v272_v36 }
 0x328   :  { %v274_v39 = vmul.f32 %v344_v34, %v273_v37 }
 0x32a   :  { %v275_v41 = vadd.f32 %v344_v34, %v274_v39 }
 0x32c   :  { %v279_v42 = vsel %vm278_vm11, %v344_v34, %v275_v41 }
 0x32d   :  { %v284_v43 = vsel %vm281_vm12, %v283_v35, %v279_v42 }
 0x32e   :  { %v285_v44 = vmul.f32 %v342_v32, %v284_v43 }
 0x330   :  { %286 = vst [vmem:[#allocation10] sm:$0xff] %v285_v44 }
 0x331   :  { %297 = dma.vmem_to_hbm [thread:$0]  %s293_s5, 128, %s295_s21, [#allocation4]  }
 0x332   :  { %471 = dma.done.wait [#allocation4], 128  }
 0x333   :  { %472 = vsyncadd [#allocation4], 4294967168 }
 0x334   :  { %302 = vsyncpa [#allocation3], 1 }
 0x335   :  { %303 = vsyncpa [#allocation6], 1 }
 0x336   :  { %304 = vsyncpa [#allocation9], 1 }
 0x337   :  { %305 = vsyncpa [#allocation4], 1 }

</bundles_post_ra>
